<compile_context>
chip_gen: v7x
topology: tpu7x:2x2x1
jax: 0.10.0
libtpu: 0.0.40
codegen_flags: <defaults>
</compile_context>

<pallas_src>
import functools

import jax
import jax.numpy as jnp
from jax.experimental import pallas as pl
from jax.experimental.pallas import tpu as pltpu


def _fcnet2_kernel(t_ref, x_ref, w1x_ref, w1t_ref, b1_ref, wh_ref, bh_ref,
                   out_ref, *, mxu_dtype):
    # First layer:  [1-t, x] @ W1 + b1
    #   = x @ W1[1:] + (b1 + W1[0]) - t * W1[0]       (b1_ref already = b1 + W1[0])
    pre = (jnp.dot(x_ref[...].astype(mxu_dtype), w1x_ref[...].astype(mxu_dtype),
                   preferred_element_type=jnp.float32)
           + b1_ref[...]
           - t_ref[...] * w1t_ref[...])            # (TILE_B,1)*(1,H) VPU broadcast
    h = jnp.maximum(pre, 0.0)                      # ReLU in f32 (VPU)

    # Head layer, fused in the same kernel (activation never leaves VMEM).
    out_ref[...] = (jnp.dot(h.astype(mxu_dtype), wh_ref[...].astype(mxu_dtype),
                            preferred_element_type=jnp.float32)
                    + bh_ref[...])


def fcnet2_forward(t, x, params, *, tile_b=512, use_bf16_matmul=False):
    """Fused Pallas forward of FCNet2: returns head(relu(linear1(cat([1-t, x]))))."""
    B = t.shape[0]
    xdim = x.shape[1]

    w1 = params["w1"].astype(jnp.float32)          # (1+xdim, H), stored (in, out)
    b1 = params["b1"].astype(jnp.float32)          # (1, H)
    wh = params["wh"].astype(jnp.float32)          # (H, wdim)
    bh = params["bh"].astype(jnp.float32)          # (1, wdim)

    w1t = w1[0:1, :]                               # row multiplying (1-t)
    w1x = w1[1:, :]                                # rows multiplying x
    b1_eff = b1 + w1t                              # fold the "+1*W1[0]" constant term

    H = w1.shape[1]
    wdim = wh.shape[1]

    t = t.astype(jnp.float32)
    x = x.astype(jnp.float32)

    # Batch tiling: weights/biases stay VMEM-resident across grid steps.
    if B <= tile_b:
        tile_b = B                     # single tile == full array -> (8,128)-safe
    pad = (-B) % tile_b
    if pad:
        t = jnp.pad(t, ((0, pad), (0, 0)))
        x = jnp.pad(x, ((0, pad), (0, 0)))
    Bp = B + pad
    grid = (pl.cdiv(Bp, tile_b),)

    mxu_dtype = jnp.bfloat16 if use_bf16_matmul else jnp.float32
    kernel = functools.partial(_fcnet2_kernel, mxu_dtype=mxu_dtype)

    const = lambda i: (0, 0)           # same weight block every grid step (resident)
    out = pl.pallas_call(
        kernel,
        out_shape=jax.ShapeDtypeStruct((Bp, wdim), jnp.float32),
        grid=grid,
        in_specs=[
            pl.BlockSpec((tile_b, 1), lambda i: (i, 0)),       # t
            pl.BlockSpec((tile_b, xdim), lambda i: (i, 0)),    # x
            pl.BlockSpec((xdim, H), const),                    # W1[1:, :]
            pl.BlockSpec((1, H), const),                       # W1[0, :]
            pl.BlockSpec((1, H), const),                       # b1 + W1[0]
            pl.BlockSpec((H, wdim), const),                    # head weight
            pl.BlockSpec((1, wdim), const),                    # head bias
        ],
        out_specs=pl.BlockSpec((tile_b, wdim), lambda i: (i, 0)),
        compiler_params=pltpu.CompilerParams(
            dimension_semantics=("parallel",)),                # v7x: shard over 2 TCs
    )(t, x, w1x, w1t, b1_eff, wh, bh)

    return out[:B]


def _xavier_uniform(key, in_f, out_f):
    # torch.nn.init.xavier_uniform_ equivalent (gain=1), stored as (in, out).
    limit = jnp.sqrt(6.0 / (in_f + out_f))
    return jax.random.uniform(key, (in_f, out_f), jnp.float32, -limit, limit)


def make_params(key, xdim, wdim, hidden):
    d_in = 1 + xdim
    keys = jax.random.split(key, 4)
    return {
        "w1": _xavier_uniform(keys[0], d_in, hidden),              # linear1.weight.T
        "b1": jax.random.normal(keys[1], (1, hidden), jnp.float32),
        "wh": _xavier_uniform(keys[2], hidden, wdim),              # head.weight.T
        "bh": jax.random.normal(keys[3], (1, wdim), jnp.float32),
    }


def fcnet2_reference(t, x, p):
    """Pure-JAX reference (matches the PyTorch FCNet2 forward)."""
    z_in = jnp.concatenate([1.0 - t, x], axis=-1)
    h = jnp.maximum(z_in @ p["w1"] + p["b1"], 0.0)
    return h @ p["wh"] + p["bh"]


if __name__ == "__main__":
    # Small cartpole-like shapes: state dim 4, control dim 2, hidden 32, batch 8.
    B, xdim, wdim, hidden = 8, 4, 2, 32

    key = jax.random.PRNGKey(0)
    k_t, k_x, k_p = jax.random.split(key, 3)
    t = jax.random.uniform(k_t, (B, 1), jnp.float32)
    x = jax.random.normal(k_x, (B, xdim), jnp.float32)
    params = make_params(k_p, xdim, wdim, hidden)

    y_out = jax.block_until_ready(fcnet2_forward(t, x, params))
    y_ref = fcnet2_reference(t, x, params)
    assert y_out.shape == (B, wdim)
    assert jnp.allclose(y_out, y_ref, atol=1e-4, rtol=1e-4)

    # Larger batch: exercises the batch grid (multiple tiles + padding path).
    B2 = 1030
    k_t2, k_x2 = jax.random.split(jax.random.PRNGKey(1), 2)
    t2 = jax.random.uniform(k_t2, (B2, 1), jnp.float32)
    x2 = jax.random.normal(k_x2, (B2, xdim), jnp.float32)
    y2 = jax.block_until_ready(fcnet2_forward(t2, x2, params))
    y2_ref = fcnet2_reference(t2, x2, params)
    assert y2.shape == (B2, wdim)
    assert jnp.allclose(y2, y2_ref, atol=1e-4, rtol=1e-4)

    # TODO(synk): float64 (PyTorch default here) has no TPU MXU path; kernel is f32.
    print("KERNEL_OK")
</pallas_src>

<mosaic_0001>
module attributes {stable_mosaic.version = 11 : i64} {
  func.func @_fcnet2_kernel(%arg0: i32, %arg1: memref<8x1xf32, #tpu.memory_space<vmem>>, %arg2: memref<8x4xf32, #tpu.memory_space<vmem>>, %arg3: memref<4x32xf32, #tpu.memory_space<vmem>>, %arg4: memref<1x32xf32, #tpu.memory_space<vmem>>, %arg5: memref<1x32xf32, #tpu.memory_space<vmem>>, %arg6: memref<32x2xf32, #tpu.memory_space<vmem>>, %arg7: memref<1x2xf32, #tpu.memory_space<vmem>>, %arg8: memref<8x2xf32, #tpu.memory_space<vmem>>) attributes {dimension_semantics = [#tpu.dimension_semantics<parallel>], iteration_bounds = array<i64: 1>, scalar_prefetch = 0 : i64, scratch_operands = 0 : i64, tpu.core_type = #tpu.core_type<tc>, window_params = [{transform_indices = @transform_0, window_bounds = array<i64: 8, 1>}, {transform_indices = @transform_1, window_bounds = array<i64: 8, 4>}, {pipeline_mode = #tpu.pipeline_mode<synchronous>, transform_indices = @transform_2, window_bounds = array<i64: 4, 32>}, {pipeline_mode = #tpu.pipeline_mode<synchronous>, transform_indices = @transform_3, window_bounds = array<i64: 1, 32>}, {pipeline_mode = #tpu.pipeline_mode<synchronous>, transform_indices = @transform_4, window_bounds = array<i64: 1, 32>}, {pipeline_mode = #tpu.pipeline_mode<synchronous>, transform_indices = @transform_5, window_bounds = array<i64: 32, 2>}, {pipeline_mode = #tpu.pipeline_mode<synchronous>, transform_indices = @transform_6, window_bounds = array<i64: 1, 2>}, {transform_indices = @transform_7, window_bounds = array<i64: 8, 2>}]} {
    %c0 = arith.constant 0 : index
    %c0_0 = arith.constant 0 : index
    %0 = vector.load %arg2[%c0, %c0_0] : memref<8x4xf32, #tpu.memory_space<vmem>>, vector<8x4xf32>
    %c0_1 = arith.constant 0 : index
    %c0_2 = arith.constant 0 : index
    %1 = vector.load %arg3[%c0_1, %c0_2] : memref<4x32xf32, #tpu.memory_space<vmem>>, vector<4x32xf32>
    %cst = arith.constant dense<0.000000e+00> : vector<8x32xf32>
    %2 = tpu.matmul %0, %1, %cst {dimension_numbers = #tpu.dot_dimension_numbers<[1], [0], [0], [1], [0, 0, 1, 1], [], []>} : vector<8x4xf32>, vector<4x32xf32>, vector<8x32xf32> -> vector<8x32xf32>
    %c0_3 = arith.constant 0 : index
    %c0_4 = arith.constant 0 : index
    %3 = vector.load %arg5[%c0_3, %c0_4] : memref<1x32xf32, #tpu.memory_space<vmem>>, vector<1x32xf32>
    %4 = vector.broadcast %3 : vector<1x32xf32> to vector<8x32xf32>
    %5 = arith.addf %2, %4 : vector<8x32xf32>
    %c0_5 = arith.constant 0 : index
    %c0_6 = arith.constant 0 : index
    %6 = vector.load %arg1[%c0_5, %c0_6] : memref<8x1xf32, #tpu.memory_space<vmem>>, vector<8x1xf32>
    %c0_7 = arith.constant 0 : index
    %c0_8 = arith.constant 0 : index
    %7 = vector.load %arg4[%c0_7, %c0_8] : memref<1x32xf32, #tpu.memory_space<vmem>>, vector<1x32xf32>
    %8 = vector.broadcast %6 : vector<8x1xf32> to vector<8x32xf32>
    %9 = vector.broadcast %7 : vector<1x32xf32> to vector<8x32xf32>
    %10 = arith.mulf %8, %9 : vector<8x32xf32>
    %11 = arith.subf %5, %10 : vector<8x32xf32>
    %cst_9 = arith.constant 0.000000e+00 : f32
    %12 = vector.broadcast %cst_9 : f32 to vector<8x32xf32>
    %13 = arith.maximumf %11, %12 : vector<8x32xf32>
    %c0_10 = arith.constant 0 : index
    %c0_11 = arith.constant 0 : index
    %14 = vector.load %arg6[%c0_10, %c0_11] : memref<32x2xf32, #tpu.memory_space<vmem>>, vector<32x2xf32>
    %cst_12 = arith.constant dense<0.000000e+00> : vector<8x2xf32>
    %15 = tpu.matmul %13, %14, %cst_12 {dimension_numbers = #tpu.dot_dimension_numbers<[1], [0], [0], [1], [0, 0, 1, 1], [], []>} : vector<8x32xf32>, vector<32x2xf32>, vector<8x2xf32> -> vector<8x2xf32>
    %c0_13 = arith.constant 0 : index
    %c0_14 = arith.constant 0 : index
    %16 = vector.load %arg7[%c0_13, %c0_14] : memref<1x2xf32, #tpu.memory_space<vmem>>, vector<1x2xf32>
    %17 = vector.broadcast %16 : vector<1x2xf32> to vector<8x2xf32>
    %18 = arith.addf %15, %17 : vector<8x2xf32>
    %c0_15 = arith.constant 0 : index
    %c0_16 = arith.constant 0 : index
    %19 = vector.load %arg8[%c0_15, %c0_16] : memref<8x2xf32, #tpu.memory_space<vmem>>, vector<8x2xf32>
    tpu.vector_store %arg8[%c0_15, %c0_16], %18 {strides = array<i32>} : memref<8x2xf32, #tpu.memory_space<vmem>>, vector<8x2xf32>,
    return
  }
  func.func @transform_0(%arg0: i32) -> (i32, i32) {
    %c0_i32 = arith.constant 0 : i32
    %c0_i32_0 = arith.constant 0 : i32
    return %arg0, %c0_i32 : i32, i32
  }
  func.func @transform_1(%arg0: i32) -> (i32, i32) {
    %c0_i32 = arith.constant 0 : i32
    %c0_i32_0 = arith.constant 0 : i32
    return %arg0, %c0_i32 : i32, i32
  }
  func.func @transform_2(%arg0: i32) -> (i32, i32) {
    %c0_i32 = arith.constant 0 : i32
    %c0_i32_0 = arith.constant 0 : i32
    %c0_i32_1 = arith.constant 0 : i32
    return %c0_i32, %c0_i32_0 : i32, i32
  }
  func.func @transform_3(%arg0: i32) -> (i32, i32) {
    %c0_i32 = arith.constant 0 : i32
    %c0_i32_0 = arith.constant 0 : i32
    %c0_i32_1 = arith.constant 0 : i32
    return %c0_i32, %c0_i32_0 : i32, i32
  }
  func.func @transform_4(%arg0: i32) -> (i32, i32) {
    %c0_i32 = arith.constant 0 : i32
    %c0_i32_0 = arith.constant 0 : i32
    %c0_i32_1 = arith.constant 0 : i32
    return %c0_i32, %c0_i32_0 : i32, i32
  }
  func.func @transform_5(%arg0: i32) -> (i32, i32) {
    %c0_i32 = arith.constant 0 : i32
    %c0_i32_0 = arith.constant 0 : i32
    %c0_i32_1 = arith.constant 0 : i32
    return %c0_i32, %c0_i32_0 : i32, i32
  }
  func.func @transform_6(%arg0: i32) -> (i32, i32) {
    %c0_i32 = arith.constant 0 : i32
    %c0_i32_0 = arith.constant 0 : i32
    %c0_i32_1 = arith.constant 0 : i32
    return %c0_i32, %c0_i32_0 : i32, i32
  }
  func.func @transform_7(%arg0: i32) -> (i32, i32) {
    %c0_i32 = arith.constant 0 : i32
    %c0_i32_0 = arith.constant 0 : i32
    return %arg0, %c0_i32 : i32, i32
  }
}

</mosaic_0001>

<bundles_post_ra>
// kernel: tpu_custom_call.1
= control target key start
LH: loop header
LB: loop body
LE: loop exit
PB: predicated region body
PF: predicated region fallthrough
CT: control target
= control target key end

     0   :  { %vm39_vm0 = vcmask 1043456   ;;  %vm35_vm1 = vcmask 31744   ;;  %v260_v0 = vmov 0.0   ;;  %vm261_vm2 = vmmov 0   ;;  %s337_s2 = inlined_call_operand.vmem [shape: f32[4,32], index: 2, kind: input, shape index: {}]   ;;  %s338_s1 = inlined_call_operand.vmem [shape: f32[8,4], index: 1, kind: input, shape index: {}]   ;;  %s339_s0 = inlined_call_operand.vmem [shape: f32[8,1], index: 0, kind: input, shape index: {}]   ;;  %s340_s5 = inlined_call_operand.vmem [shape: f32[32,2], index: 5, kind: input, shape index: {}]   ;;  %s341_s3 = inlined_call_operand.vmem [shape: f32[1,32], index: 3, kind: input, shape index: {}]   ;;  %s342_s4 = inlined_call_operand.vmem [shape: f32[1,32], index: 4, kind: input, shape index: {}]   ;;  %s343_s6 = inlined_call_operand.vmem [shape: f32[1,2], index: 6, kind: input, shape index: {}]   ;;  %s344_s7 = inlined_call_operand.vmem [shape: f32[8,2], index: 7, kind: output, shape index: {}]  }
   0x1   :  { %233 = vmatprep.subr.mxu0 %v260_v0  ;;  %v27_v1 = vld [vmem:[%s337_s2] sm:$0xf]  ;;  %235 = vmatprep.mubr.msk.f32.mxu0 %vm261_vm2, %v260_v0  ;;  %v262_v4 = vmov 0   ;;  %v263_v5 = vmov 0.0|0.0   ;;  %v130_v7 = vld [vmem:[%s340_s5 + $0x8] sm:$0xff]  ;;  %v131_v9 = vld [vmem:[%s340_s5 + $0x10] sm:$0xff] }
   0x2   :  { %v26_v2 = vld [vmem:[%s338_s1] sm:$0xff]  ;;  %234 = vmatpush3.msk.msra.mxu0 %vm39_vm0, %v27_v1  ;;  %259 = vset.pattern.permute.xlu0 %v262_v4  ;;  %v132_v10 = vld [vmem:[%s340_s5 + $0x18] sm:$0xff]  ;;  %vm140_vm3 = vcmask 261120   ;;  %vm214_vm4 = vcmask 15360  }
   0x3   :  { %v113_v3 = vld [vmem:[%s339_s0] sm:$0xff]  ;;  %236 = vmatmul.mubr.msk.f32.vlgmr.msra.gmra.mrb[0].mxu0 %vm35_vm1, %v26_v2  ;;  %249 = vmatprep.subr.bf16.mxu1 %v263_v5  ;;  %v253_v11 = vpack.c.bf16 %v132_v10, %v131_v9 }
   0x4   :  { %117 = vperm.xlu0 %259, %v113_v3   ;;  %246 = vmatprep.mubr.msk.f32.mxu1 %vm261_vm2, %v260_v0  ;;  %v129_v6 = vld [vmem:[%s340_s5] sm:$0xff] }
   0x5   :  { %v250_v8 = vpack.c.bf16 %v130_v7, %v129_v6  ;;  %v223_v12 = vld [vmem:[%s341_s3] ss:$0 sm:$0xff] }
   0x6   :  { %v220_v14 = vld [vmem:[%s342_s4] ss:$0 sm:$0xff] }
   0x7   :  { %251 = vmatpush3.bf16.msra.mxu1 %v250_v8  ;;  %v224_v21 = vld [vmem:[%s343_s6] ss:$0 sm:$0xff] }
   0x8   :  { %252 = vmatprep.subr.bf16.mxu1 %v263_v5 }
   0xb   :  { %254 = vmatpush3.bf16.msra.mxu1 %v253_v11 }
  0x83   :  { %v118_v13 = vpop.permute.xlu0 %117 }
  0x84   :  { %v126_v15 = vmul.f32 %v223_v12, %v118_v13 }
  0xd6   :  { %v109_v16 = vpop.f32.mrb[0].mxu0 }
  0xd7   :  { %v110_v17 = vadd.f32 %v220_v14, %v109_v16  ;;  %v237_v18 = vpop.f32.mrb[1].mxu0 }
  0xd9   :  { %v127_v19 = vsub.f32 %v110_v17, %v126_v15 }
  0xdb   :  { %v128_v20 = vmax.f32 %v127_v19, 0.0 }
  0xdd   :  { %247 = vmatmul.mubr.msk.f32.vlgmr.msra.gmra.mrb[0].mxu1 %vm140_vm3, %v128_v20 }
 0x1b0   :  { %v210_v22 = vpop.f32.mrb[0].mxu1 }
 0x1b1   :  { %v211_v23 = vadd.f32 %v224_v21, %v210_v22  ;;  %v248_v24 = vpop.f32.mrb[1].mxu1 }
 0x1b3   :  { %215 = vst.msk [vmem:[%s344_s7] sm:$0xff] %vm214_vm4, %v211_v23 }

</bundles_post_ra>
